<compile_context>
chip_gen: v7x
topology: tpu7x:2x2x1
jax: 0.10.0
libtpu: 0.0.40
codegen_flags: <defaults>
</compile_context>

<pallas_src>
import functools
import numpy as np
import jax
import jax.numpy as jnp
from jax.experimental import pallas as pl
from jax.experimental.pallas import tpu as pltpu


# ----------------------------- operator construction -------------------------

def _gaussian_kernel1d(ksize: int, sigma: float) -> np.ndarray:
    # matches kornia get_gaussian_kernel1d for odd ksize
    x = np.arange(ksize, dtype=np.float64) - (ksize - 1) / 2.0
    g = np.exp(-(x * x) / (2.0 * sigma * sigma))
    return g / g.sum()


def _conv_band(L: int, taps: np.ndarray) -> np.ndarray:
    """(L+K-1, L) banded matrix M with M[i+k, i] = taps[k] ('valid' correlation)."""
    K = len(taps)
    M = np.zeros((L + K - 1, L), dtype=np.float64)
    idx = np.arange(L)
    for k in range(K):
        M[idx + k, idx] += taps[k]
    return M


def _clamped_stencil(L: int, taps) -> np.ndarray:
    """(L, L) stencil matrix with replicate ('edge') boundary handling.
    taps: iterable of (offset, weight); M[k, i] = sum w * [k == clamp(i+off, 0, L-1)]."""
    M = np.zeros((L, L), dtype=np.float64)
    for i in range(L):
        for off, w in taps:
            k = min(max(i + off, 0), L - 1)
            M[k, i] += w
    return M


def _edge_operators(H: int, W: int, ksize: int = 5, sigma: float = 1.5):
    g = _gaussian_kernel1d(ksize, sigma)
    Gy = _conv_band(H, g)                       # (H+4, H) : gaussian along y
    Gx = _conv_band(W, g)                       # (W+4, W) : gaussian along x
    smooth = [(-1, 1.0), (0, 2.0), (1, 1.0)]    # sobel smoothing taps [1, 2, 1]
    diff = [(-1, -1.0), (1, 1.0)]               # sobel central difference [-1, 0, 1]
    Sh, Dh = _clamped_stencil(H, smooth), _clamped_stencil(H, diff)
    Sw, Dw = _clamped_stencil(W, smooth), _clamped_stencil(W, diff)
    # Sobel(normalized=True): each 3x3 kernel is divided by sum(|k|) = 8.
    Ax = (Gy @ Sh).T          # (H, H+4)  = Sh^T @ Gy^T   (y-smooth after blur)
    Ay = (Gy @ Dh).T          # (H, H+4)  = Dh^T @ Gy^T   (y-diff after blur)
    Bx = (Gx @ Dw) / 8.0      # (W+4, W)                  (x-diff after blur, /8)
    By = (Gx @ Sw) / 8.0      # (W+4, W)                  (x-smooth after blur, /8)
    to = lambda a: jnp.asarray(a, jnp.float32)
    return to(Ax), to(Ay), to(Bx), to(By)


# ----------------------------- Pallas kernel ---------------------------------

def _edge_kernel(xp_ref, ax_ref, ay_ref, bx_ref, by_ref, out_ref, *, eps):
    xp = xp_ref[0]                                                    # (H+4, W+4) f32
    lx = jnp.dot(ax_ref[...], xp, preferred_element_type=jnp.float32)  # (H, W+4)
    ly = jnp.dot(ay_ref[...], xp, preferred_element_type=jnp.float32)  # (H, W+4)
    gx = jnp.dot(lx, bx_ref[...], preferred_element_type=jnp.float32)  # (H, W)
    gy = jnp.dot(ly, by_ref[...], preferred_element_type=jnp.float32)  # (H, W)
    out_ref[0] = jnp.sqrt(gx * gx + gy * gy + eps)


def edge_forward(x_nchw):
    """Edge.forward: NCHW float input -> NCHW edge magnitude (same shape)."""
    N, C, H, W = x_nchw.shape
    assert H >= 3 and W >= 3, "reflect padding of 2 requires spatial dims >= 3"
    B = N * C
    planes = x_nchw.reshape(B, H, W).astype(jnp.float32)
    # GaussianBlur2d default border_type='reflect', pad = kernel//2 = 2
    xpad = jnp.pad(planes, ((0, 0), (2, 2), (2, 2)), mode="reflect")
    Ax, Ay, Bx, By = _edge_operators(H, W)

    const2d = lambda b: (0, 0)   # operator matrices stay resident across grid steps
    out = pl.pallas_call(
        functools.partial(_edge_kernel, eps=1e-6),
        out_shape=jax.ShapeDtypeStruct((B, H, W), jnp.float32),
        grid=(B,),
        in_specs=[
            pl.BlockSpec((1, H + 4, W + 4), lambda b: (b, 0, 0)),
            pl.BlockSpec((H, H + 4), const2d),
            pl.BlockSpec((H, H + 4), const2d),
            pl.BlockSpec((W + 4, W), const2d),
            pl.BlockSpec((W + 4, W), const2d),
        ],
        out_specs=pl.BlockSpec((1, H, W), lambda b: (b, 0, 0)),
        compiler_params=pltpu.CompilerParams(
            dimension_semantics=("parallel",)),
    )(xpad, Ax, Ay, Bx, By)
    return out.reshape(N, C, H, W)


if __name__ == "__main__":
    key = jax.random.PRNGKey(0)
    x = jax.random.normal(key, (2, 4, 16, 16), jnp.float32)   # NCHW, toy size

    out = jax.block_until_ready(jax.jit(edge_forward)(x))
    assert out.shape == x.shape, out.shape
    assert bool(jnp.all(jnp.isfinite(out)))

    # Cross-check the Pallas kernel against a plain-JAX evaluation of the same operators.
    N, C, H, W = x.shape
    planes = x.reshape(N * C, H, W)
    xpad = jnp.pad(planes, ((0, 0), (2, 2), (2, 2)), mode="reflect")
    Ax, Ay, Bx, By = _edge_operators(H, W)
    gx = jnp.einsum("hk,bkl,lw->bhw", Ax, xpad, Bx)
    gy = jnp.einsum("hk,bkl,lw->bhw", Ay, xpad, By)
    ref = jnp.sqrt(gx * gx + gy * gy + 1e-6).reshape(N, C, H, W)
    assert bool(jnp.allclose(out, ref, rtol=2e-2, atol=2e-2)), \
        float(jnp.max(jnp.abs(out - ref)))

    print("KERNEL_OK")
</pallas_src>

<mosaic_0001>
module attributes {stable_mosaic.version = 11 : i64} {
  func.func @_edge_kernel(%arg0: i32, %arg1: memref<1x20x20xf32, #tpu.memory_space<vmem>>, %arg2: memref<16x20xf32, #tpu.memory_space<vmem>>, %arg3: memref<16x20xf32, #tpu.memory_space<vmem>>, %arg4: memref<20x16xf32, #tpu.memory_space<vmem>>, %arg5: memref<20x16xf32, #tpu.memory_space<vmem>>, %arg6: memref<1x16x16xf32, #tpu.memory_space<vmem>>) attributes {dimension_semantics = [#tpu.dimension_semantics<parallel>], iteration_bounds = array<i64: 8>, scalar_prefetch = 0 : i64, scratch_operands = 0 : i64, tpu.core_type = #tpu.core_type<tc>, window_params = [{transform_indices = @transform_0, window_bounds = array<i64: 1, 20, 20>}, {pipeline_mode = #tpu.pipeline_mode<synchronous>, transform_indices = @transform_1, window_bounds = array<i64: 16, 20>}, {pipeline_mode = #tpu.pipeline_mode<synchronous>, transform_indices = @transform_2, window_bounds = array<i64: 16, 20>}, {pipeline_mode = #tpu.pipeline_mode<synchronous>, transform_indices = @transform_3, window_bounds = array<i64: 20, 16>}, {pipeline_mode = #tpu.pipeline_mode<synchronous>, transform_indices = @transform_4, window_bounds = array<i64: 20, 16>}, {transform_indices = @transform_5, window_bounds = array<i64: 1, 16, 16>}]} {
    %c0 = arith.constant 0 : index
    %c0_0 = arith.constant 0 : index
    %c0_1 = arith.constant 0 : index
    %0 = vector.load %arg1[%c0, %c0_0, %c0_1] : memref<1x20x20xf32, #tpu.memory_space<vmem>>, vector<1x20x20xf32>
    %1 = vector.shape_cast %0 : vector<1x20x20xf32> to vector<20x20xf32>
    %c0_2 = arith.constant 0 : index
    %c0_3 = arith.constant 0 : index
    %2 = vector.load %arg2[%c0_2, %c0_3] : memref<16x20xf32, #tpu.memory_space<vmem>>, vector<16x20xf32>
    %cst = arith.constant dense<0.000000e+00> : vector<16x20xf32>
    %3 = tpu.matmul %2, %1, %cst {dimension_numbers = #tpu.dot_dimension_numbers<[1], [0], [0], [1], [0, 0, 1, 1], [], []>} : vector<16x20xf32>, vector<20x20xf32>, vector<16x20xf32> -> vector<16x20xf32>
    %c0_4 = arith.constant 0 : index
    %c0_5 = arith.constant 0 : index
    %4 = vector.load %arg3[%c0_4, %c0_5] : memref<16x20xf32, #tpu.memory_space<vmem>>, vector<16x20xf32>
    %cst_6 = arith.constant dense<0.000000e+00> : vector<16x20xf32>
    %5 = tpu.matmul %4, %1, %cst_6 {dimension_numbers = #tpu.dot_dimension_numbers<[1], [0], [0], [1], [0, 0, 1, 1], [], []>} : vector<16x20xf32>, vector<20x20xf32>, vector<16x20xf32> -> vector<16x20xf32>
    %c0_7 = arith.constant 0 : index
    %c0_8 = arith.constant 0 : index
    %6 = vector.load %arg4[%c0_7, %c0_8] : memref<20x16xf32, #tpu.memory_space<vmem>>, vector<20x16xf32>
    %cst_9 = arith.constant dense<0.000000e+00> : vector<16x16xf32>
    %7 = tpu.matmul %3, %6, %cst_9 {dimension_numbers = #tpu.dot_dimension_numbers<[1], [0], [0], [1], [0, 0, 1, 1], [], []>} : vector<16x20xf32>, vector<20x16xf32>, vector<16x16xf32> -> vector<16x16xf32>
    %c0_10 = arith.constant 0 : index
    %c0_11 = arith.constant 0 : index
    %8 = vector.load %arg5[%c0_10, %c0_11] : memref<20x16xf32, #tpu.memory_space<vmem>>, vector<20x16xf32>
    %cst_12 = arith.constant dense<0.000000e+00> : vector<16x16xf32>
    %9 = tpu.matmul %5, %8, %cst_12 {dimension_numbers = #tpu.dot_dimension_numbers<[1], [0], [0], [1], [0, 0, 1, 1], [], []>} : vector<16x20xf32>, vector<20x16xf32>, vector<16x16xf32> -> vector<16x16xf32>
    %10 = arith.mulf %7, %7 : vector<16x16xf32>
    %11 = arith.mulf %9, %9 : vector<16x16xf32>
    %12 = arith.addf %10, %11 : vector<16x16xf32>
    %cst_13 = arith.constant 9.99999997E-7 : f32
    %13 = vector.broadcast %cst_13 : f32 to vector<16x16xf32>
    %14 = arith.addf %12, %13 : vector<16x16xf32>
    %15 = math.sqrt %14 : vector<16x16xf32>
    %c0_14 = arith.constant 0 : index
    %c0_15 = arith.constant 0 : index
    %c0_16 = arith.constant 0 : index
    %16 = vector.load %arg6[%c0_14, %c0_15, %c0_16] : memref<1x16x16xf32, #tpu.memory_space<vmem>>, vector<1x16x16xf32>
    %17 = vector.shape_cast %16 : vector<1x16x16xf32> to vector<16x16xf32>
    %18 = vector.shape_cast %15 : vector<16x16xf32> to vector<1x16x16xf32>
    tpu.vector_store %arg6[%c0_14, %c0_15, %c0_16], %18 {strides = array<i32>} : memref<1x16x16xf32, #tpu.memory_space<vmem>>, vector<1x16x16xf32>,
    return
  }
  func.func @transform_0(%arg0: i32) -> (i32, i32, i32) {
    %c0_i32 = arith.constant 0 : i32
    %c0_i32_0 = arith.constant 0 : i32
    %c0_i32_1 = arith.constant 0 : i32
    return %arg0, %c0_i32, %c0_i32_0 : i32, i32, i32
  }
  func.func @transform_1(%arg0: i32) -> (i32, i32) {
    %c0_i32 = arith.constant 0 : i32
    %c0_i32_0 = arith.constant 0 : i32
    %c0_i32_1 = arith.constant 0 : i32
    return %c0_i32, %c0_i32_0 : i32, i32
  }
  func.func @transform_2(%arg0: i32) -> (i32, i32) {
    %c0_i32 = arith.constant 0 : i32
    %c0_i32_0 = arith.constant 0 : i32
    %c0_i32_1 = arith.constant 0 : i32
    return %c0_i32, %c0_i32_0 : i32, i32
  }
  func.func @transform_3(%arg0: i32) -> (i32, i32) {
    %c0_i32 = arith.constant 0 : i32
    %c0_i32_0 = arith.constant 0 : i32
    %c0_i32_1 = arith.constant 0 : i32
    return %c0_i32, %c0_i32_0 : i32, i32
  }
  func.func @transform_4(%arg0: i32) -> (i32, i32) {
    %c0_i32 = arith.constant 0 : i32
    %c0_i32_0 = arith.constant 0 : i32
    %c0_i32_1 = arith.constant 0 : i32
    return %c0_i32, %c0_i32_0 : i32, i32
  }
  func.func @transform_5(%arg0: i32) -> (i32, i32, i32) {
    %c0_i32 = arith.constant 0 : i32
    %c0_i32_0 = arith.constant 0 : i32
    %c0_i32_1 = arith.constant 0 : i32
    return %arg0, %c0_i32, %c0_i32_0 : i32, i32, i32
  }
}

</mosaic_0001>

<bundles_post_ra>
// kernel: edge_forward.1
= control target key start
LH: loop header
LB: loop body
LE: loop exit
PB: predicated region body
PF: predicated region fallthrough
CT: control target
= control target key end

     0   :  { %10 = vsyncpa [#allocation3], 0  ;;  %s1060_s0 = inlined_call_operand.vmem [shape: f32[8,20,20], index: 0, kind: input, shape index: {}]   ;;  %s1061_s1 = inlined_call_operand.vmem [shape: f32[16,20], index: 1, kind: input, shape index: {}]   ;;  %s1062_s2 = inlined_call_operand.vmem [shape: f32[16,20], index: 2, kind: input, shape index: {}]   ;;  %s1063_s3 = inlined_call_operand.vmem [shape: f32[20,16], index: 3, kind: input, shape index: {}]   ;;  %s1064_s4 = inlined_call_operand.vmem [shape: f32[20,16], index: 4, kind: input, shape index: {}]   ;;  %s1065_s5 = inlined_call_operand.hbm [shape: f32[8,16,16], index: 5, kind: output, shape index: {}]  }
   0x1   :  { %12 = vsyncpa [#allocation3 + $0x1], 0  ;;  %s911_s18 = smov 0   ;;  %s913_s19 = smov 0  }
   0x2   :  { %s915_s20 = smov 0   ;;  %s917_s21 = smov 0  }
   0x3 LB: > { %s932_s22 = sadd.s32 4294967295, %s876_s21   ;;  %s672_s23 = sadd.s32 4294967294, %s876_s21   ;;  %s876_s21 = sphi %s917_s21, %s1071_s21   ;;  %s872_s20 = sphi %s915_s20, %s1070_s20   ;;  %s868_s19 = sphi %s913_s19, %s1069_s19   ;;  %s864_s18 = sphi %s911_s18, %s1068_s18  }
   0x4   : > { %s936_s24 = sadd.s32 1, %s876_s21   ;;  %s135_s25 = sadd.s32 1, %s872_s20 }
   0x5   : > { %s132_s26 = ssub.s32 %s876_s21, %s936_s24  ;;  %p145_p0 = scmp.ne.s32.totalorder %s872_s20, %s868_s19 }
   0x6   : > { %p133_p1 = scmp.eq.s32.totalorder %s132_s26, 0  ;;  %p146_p2 = scmp.eq.s32.totalorder %s932_s22, 7 }
   0x7   : > { %p151_p3 = scmp.ne.s32.totalorder %s868_s19, %s864_s18  ;;  %p152_p4 = scmp.eq.s32.totalorder %s672_s23, 7 }
   0x8   : > { %s947_s27 = scalar_select %p133_p1, %s872_s20, %s135_s25  }
   0x9   : > { %p949_p5 = por %p146_p2, %p145_p0  ;;  %p953_p6 = por %p152_p4, %p151_p3 }
   0xa   : > { %p675_p7 = scmp.ge.s32.totalorder %s876_s21, 1  ;;  %p190_p8 = scmp.lt.s32.totalorder %s876_s21, 9 }
   0xc   : > { %p191_p9 = pnand %p675_p7, %p190_p8 }
   0xd   : > { %p218_p10 = scmp.lt.s32.totalorder (!%p191_p9), %s932_s22, 7  ;;  %v226_v0 = vld [vmem:[%s1061_s1] sm:$0xff] (!%p191_p9)  ;;  %vm228_vm0 = vcmask (!%p191_p9), 162816   ;;  %vm235_vm1 = vcmask (!%p191_p9), 1043456   ;;  %v398_v7 = vld [vmem:[%s1063_s3 + $0x8] sm:$0xff] (!%p191_p9)  ;;  %s215_s14 = sand.u32 (!%p191_p9), 1, %s868_s19  }
   0xe   : > { %194 = sbr.rel (%p191_p9) target bundleno = 498 (0x1f2), region = 40  ;;  %v314_v1 = vld [vmem:[%s1062_s2] sm:$0xff] (!%p191_p9)  ;;  %722 = vmatprep.mubr.msk.f32.mxu0 (!%p191_p9), %vm228_vm0, %v226_v0  ;;  %v485_v9 = vld [vmem:[%s1064_s4 + $0x8] sm:$0xff] (!%p191_p9)  ;;  %v399_v14 = vld [vmem:[%s1063_s3 + $0x10] sm:$0xf] (!%p191_p9)  ;;  %s676_s15 = sshll.u32 (!%p191_p9), %s215_s14, 4 }
   0xf   : > { %731 = vmatprep.mubr.msk.f32.mxu1 (!%p191_p9), %vm228_vm0, %v314_v1  ;;  %v397_v6 = vld [vmem:[%s1063_s3] sm:$0xff] (!%p191_p9)  ;;  %v227_v10 = vld [vmem:[%s1061_s1 + $0x8] sm:$0xff] (!%p191_p9)  ;;  %v486_v15 = vld [vmem:[%s1064_s4 + $0x10] sm:$0xf] (!%p191_p9)  ;;  %s695_s16 = sshll.u32 (!%p191_p9), %s932_s22, 8  ;;  %s217_s17 = scalar_lea.vmem (!%p191_p9), [#allocation2], %s676_s15 }
  0x10   : > { %v484_v8 = vld [vmem:[%s1064_s4] sm:$0xff] (!%p191_p9)  ;;  %v315_v11 = vld [vmem:[%s1062_s2 + $0x8] sm:$0xff] (!%p191_p9)  ;;  %v760_v12 = vpack.c.bf16 (!%p191_p9), %v398_v7, %v397_v6  ;;  %s610_s23 = sshll.u32 (!%p191_p9), %s217_s17, 4  ;;  %vm593_vm3 = vcmask (!%p191_p9), 130048   ;;  %s1015_s30 = scalar_lea.hbm (!%p191_p9), %s1065_s5, %s695_s16  ;;  %s1017_s23 = int_to_ptr.vmem [resolvable:$true] %s610_s23 }
  0x11   : > { %v764_v13 = vpack.c.bf16 (!%p191_p9), %v485_v9, %v484_v8  ;;  %s814_s6 = scalar_lea.vmem (!%p191_p9), %s1017_s23, 256  ;;  %s878_s7 = smov (!%p191_p9), [#allocation2]  }
  0x12   : > { %p815_p11 = scmp.ne.s32.totalorder (!%p191_p9), %s1017_s23, %s814_s6  ;;  %s818_s8 = sshll.u32 (!%p191_p9), %s878_s7, 4  ;;  %s819_s8 = int_to_ptr.vmem [resolvable:$false] %s818_s8 }
  0x13   : > { %p821_p0 = scmp.lt.s32.totalorder (!%p191_p9), %s1017_s23, %s819_s8 }
  0x14   : > { %p816_p12 = pnand (!%p191_p9), %p815_p11, %p949_p5 }
  0x15   : > { %s219_s9 = scalar_select %p218_p10, %s932_s22, 7 }
  0x16   : > { %s1019_s22 = scalar_lea.sflag [#allocation3], %s215_s14  ;;  %p817_p13 = pneg %p816_p12 }
  0x17   : > { %s768_s10 = smul.u32 24, %s219_s9  ;;  %s820_s9 = scalar_lea.vmem %s819_s8, 512 }
  0x18   : > { %p822_p1 = scmp.lt.s32.totalorder %s820_s9, %s814_s6 }
  0x19   : > { %s222_s13 = scalar_lea.vmem %s1060_s0, %s768_s10 }
  0x1a   : > { %v223_v2 = vld [vmem:[%s222_s13] sm:$0xff]  ;;  %v224_v3 = vld [vmem:[%s222_s13 + $0x8] sm:$0xff]  ;;  %v225_v5 = vld [vmem:[%s222_s13 + $0x10] sm:$0xf]  ;;  %p823_p2 = por %p822_p1, %p821_p0 }
  0x1b   : > { %v752_v4 = vpack.c.bf16 %v224_v3, %v223_v2 }
  0x1c   : > { %p824_p3 = pnand %p823_p2, %p817_p13 }
  0x1d   : > { %753 = vmatprep.subr.bf16.mxu0 %v752_v4  ;;  %757 = vmatprep.subr.bf16.mxu1 %v752_v4 }
  0x1e   : > { %755 = vmatpush3.bf16.msra.mxu0 %v752_v4  ;;  %759 = vmatpush3.bf16.msra.mxu1 %v752_v4 }
  0x1f   : > { %720 = vmatprep.subr.msk.mxu0 %vm235_vm1, %v225_v5  ;;  %729 = vmatprep.subr.msk.mxu1 %vm235_vm1, %v225_v5 }
  0x22   : > { %721 = vmatpush3.msk.msra.mxu0 %vm235_vm1, %v225_v5  ;;  %730 = vmatpush3.msk.msra.mxu1 %vm235_vm1, %v225_v5 }
  0x23   : > { %723 = vmatmul.mubr.msk.f32.vlgmr.msra.gmra.mrb[0].mxu0 %vm228_vm0, %v227_v10  ;;  %732 = vmatmul.mubr.msk.f32.vlgmr.msra.gmra.mrb[0].mxu1 %vm228_vm0, %v315_v11 }
  0x24   : > { %761 = vmatprep.subr.bf16.mxu0 %v760_v12  ;;  %765 = vmatprep.subr.bf16.mxu1 %v764_v13 }
  0x25   : > { %763 = vmatpush3.bf16.msra.mxu0 %v760_v12  ;;  %767 = vmatpush3.bf16.msra.mxu1 %v764_v13 }
  0x26   : > { %738 = vmatprep.subr.msk.mxu0 %vm235_vm1, %v399_v14  ;;  %747 = vmatprep.subr.msk.mxu1 %vm235_vm1, %v486_v15 }
  0x29   : > { %739 = vmatpush3.msk.msra.mxu0 %vm235_vm1, %v399_v14  ;;  %748 = vmatpush3.msk.msra.mxu1 %vm235_vm1, %v486_v15 }
  0xf6   : > { %v724_v16 = vpop.f32.mrb[0].mxu0  ;;  %v733_v17 = vpop.f32.mrb[0].mxu1 }
  0xf7   : > { %v305_v18 = vpop.f32.mrb[1].mxu0  ;;  %v388_v19 = vpop.f32.mrb[1].mxu1 }
  0xf8   : > { %740 = vmatprep.mubr.msk.f32.mxu0 %vm228_vm0, %v305_v18  ;;  %749 = vmatprep.mubr.msk.f32.mxu1 %vm228_vm0, %v388_v19 }
  0xf9   : > { %741 = vmatmul.mubr.msk.f32.vlgmr.msra.gmra.mrb[2].mxu0 %vm228_vm0, %v724_v16  ;;  %750 = vmatmul.mubr.msk.f32.vlgmr.msra.gmra.mrb[2].mxu1 %vm228_vm0, %v733_v17 }
 0x1cc   : > { %v742_v20 = vpop.f32.mrb[2].mxu0  ;;  %v751_v21 = vpop.f32.mrb[2].mxu1 }
 0x1cd   : > { %v572_v22 = vmul.f32 %v742_v20, %v742_v20  ;;  %v574_v23 = vmul.f32 %v751_v21, %v751_v21  ;;  %v475_v24 = vpop.f32.mrb[3].mxu0  ;;  %v562_v25 = vpop.f32.mrb[3].mxu1 }
 0x1ce   : > { %v571_v26 = vmul.f32 %v475_v24, %v475_v24  ;;  %v573_v27 = vmul.f32 %v562_v25, %v562_v25 }
 0x1cf   : > { %v576_v28 = vadd.f32 %v574_v23, %v572_v22 }
 0x1d0   : > { %v575_v29 = vadd.f32 %v573_v27, %v571_v26 }
 0x1d1   : > { %v578_v30 = vadd.f32 1e-06, %v576_v28 }
 0x1d2   : > { %v577_v31 = vadd.f32 1e-06, %v575_v29 }
 0x1d3   : > { %810 = vrsqrt.f32 %v578_v30  ;;  %vm588_vm2 = vcmp.eq.f32.partialorder %v578_v30, inf  ;;  %v591_v36 = vand.u32 2147483648, %v578_v30  ;;  %vm590_vm5 = vcmp.eq.f32.partialorder %v578_v30, 0.0 }
 0x1d4   : > { %812 = vrsqrt.f32 %v577_v31  ;;  %vm581_vm4 = vcmp.eq.f32.partialorder %v577_v31, inf  ;;  %v584_v37 = vand.u32 2147483648, %v577_v31  ;;  %vm583_vm6 = vcmp.eq.f32.partialorder %v577_v31, 0.0 }
 0x1dd   : > { %v811_v32 = vpop.eup %810 }
 0x1de   : > { %v813_v33 = vpop.eup %812  ;;  %v587_v34 = vmul.f32 %v811_v32, %v578_v30 }
 0x1df   : > { %v580_v35 = vmul.f32 %v813_v33, %v577_v31 }
 0x1e0   : > { %v589_v38 = vsel %vm588_vm2, %v578_v30, %v587_v34 }
 0x1e1   : > { %v582_v39 = vsel %vm581_vm4, %v577_v31, %v580_v35  ;;  %v592_v40 = vsel %vm590_vm5, %v591_v36, %v589_v38 }
 0x1e2   : > { %v585_v41 = vsel %vm583_vm6, %v584_v37, %v582_v39  ;;  %595 = vst.msk [vmem:[%s217_s17 + $0x8] sm:$0xff] %vm593_vm3, %v592_v40 }
 0x1e3   : > { %594 = vst.msk [vmem:[%s217_s17] sm:$0xff] %vm593_vm3, %v585_v41 }
 0x1e4   : > { %827 = shalt.err (!%p824_p3)
}
 0x1e5   : > { %s828_s10 = scalar_lea.hbm %s1015_s30, 256  ;;  %s832_s13 = scalar_lea.hbm %s1065_s5, 2048 }
 0x1e6   : > { %p829_p4 = scmp.ne.s32.totalorder %s1015_s30, %s828_s10  ;;  %p833_p9 = scmp.lt.u32.totalorder %s1015_s30, %s1065_s5 }
 0x1e7   : > { %p834_p10 = scmp.lt.u32.totalorder %s832_s13, %s828_s10  ;;  %p836_p12 = scmp.lt.u32.totalorder %s828_s10, %s1015_s30 }
 0x1e8   : > { %p830_p7 = pnand %p829_p4, %p949_p5 }
 0x1e9   : > { %p835_p11 = por %p834_p10, %p833_p9 }
 0x1ea   : > { %p831_p8 = pneg %p830_p7 }
 0x1eb   : > { %p837_p13 = por %p836_p12, %p835_p11 }
 0x1ed   : > { %p838_p0 = pnand %p837_p13, %p831_p8 }
 0x1ef   : > { %841 = shalt.err (!%p838_p0)
}
 0x1f0   : > { %s879_s16 = smov 128   ;;  %s880_s17 = smov 8  }
 0x1f1   : > { %769 = dma.vmem_to_hbm [thread:$0]  (%p949_p5), %s1017_s23, 256, %s1015_s30, %s1019_s22, %s879_s16, %s879_s16, %s880_s17  }
 0x1f2 PF: > { %p775_p1 = scmp.ge.s32.totalorder %s876_s21, 2  ;;  %s625_s25 = sand.u32 1, %s864_s18  }
 0x1f3   : > { %s626_s26 = scalar_lea.sflag [#allocation3], %s625_s25 }
 0x1f4   : > { %p772_p2 = pnand %p775_p1, %p953_p6 }
 0x1f6   : > { %859 = dma.done.wait (!%p772_p2), %s626_s26, 256  }
 0x1f7   : > { %861 = vsyncadd (!%p772_p2), %s626_s26, 4294967040  ;;  %p15_p3 = scmp.ge.s32.totalorder %s936_s24, 10   ;;  %s1068_s18 = smov %s868_s19 }
 0x1f8   : > { %s1069_s19 = smov %s872_s20  ;;  %s1070_s20 = smov %s947_s27 }
 0x1f9   : > { %s1071_s21 = smov %s936_s24  ;;  %17 = sbr.rel (!%p15_p3) target bundleno = 3 (0x3), region = 75 }
 0x200   :  { %631 = vsyncpa [#allocation3], 1 }
 0x201   :  { %633 = vsyncpa [#allocation3 + $0x1], 1 }

</bundles_post_ra>
